<compile_context>
chip_gen: v7x
topology: tpu7x:2x2x1
jax: 0.10.0
libtpu: 0.0.40
codegen_flags: <defaults>
</compile_context>

<pallas_src>
import jax
import jax.numpy as jnp
from jax.experimental import pallas as pl
from jax.experimental.pallas import tpu as pltpu

# qint32, signed -> quant range
_BIT = 32
_Q_MIN = float(-(1 << (_BIT - 1)))        # -2147483648.0
_Q_MAX = float((1 << (_BIT - 1)) - 1)     # 2147483647 is not representable in f32; clip
                                          # effectively uses 2^31 — differs from torch only
                                          # exactly at the positive saturation boundary.

_LANES = 128
_SMALL_FAST_PATH_ELEMS = 65536            # below this, plain jnp (XLA fuses it)
_SINGLE_BLOCK_MAX_ROWS = 1024             # <= 512 KiB f32 -> one full-extent block
_DEFAULT_TILE_BUDGET_BYTES = 2 * 1024 * 1024   # per-block byte budget (per buffer)


def _fake_quant_kernel(sc_ref, x_ref, out_ref):
    # sc_ref (SMEM): [scale, 1/scale].
    # torch: q = clamp(nearbyint(x * inv_scale) + zp, q_min, q_max); out = (q - zp) * scale
    # zp = 0 for BiasObserver.  jnp.round == round-half-to-even == nearbyint.
    scale = sc_ref[0]
    inv_scale = sc_ref[1]
    x = x_ref[...].astype(jnp.float32)
    q = jnp.clip(jnp.round(x * inv_scale), _Q_MIN, _Q_MAX)
    out_ref[...] = (q * scale).astype(out_ref.dtype)


def _fake_quant_jnp(x, scale):
    inv_scale = jnp.float32(1.0) / scale
    q = jnp.clip(jnp.round(x.astype(jnp.float32) * inv_scale), _Q_MIN, _Q_MAX)
    return (q * scale).astype(x.dtype)


def bias_observer_forward(x, w_scale, act_scale, *, observe=True, fake_quant=True,
                          prev_scale=1.0,
                          small_input_elems=_SMALL_FAST_PATH_ELEMS,
                          tile_budget_bytes=_DEFAULT_TILE_BUDGET_BYTES):
    """JAX/Pallas equivalent of BiasObserver.forward.

    Returns (out, scale) where `scale` mirrors the module's self.scale buffer
    after the forward pass (the in-place buffer copy_ has no JAX equivalent,
    so the updated scale is returned as a value).
    """
    w_scale = jnp.asarray(w_scale, jnp.float32)
    act_scale = jnp.asarray(act_scale, jnp.float32)
    # self.scale.copy_(w_ob.scale * act_ob.scale) happens only when observing;
    # otherwise the buffer keeps its previous value.
    scale = w_scale * act_scale if observe else jnp.asarray(prev_scale, jnp.float32)
    if not fake_quant:
        return x, scale

    orig_shape = x.shape
    orig_dtype = x.dtype
    total = x.size
    itemsize = jnp.dtype(orig_dtype).itemsize

    # Fast path: typical BiasObserver inputs are tiny bias vectors.  A fused
    # XLA elementwise op beats custom-call launch + DMA + reshape plumbing.
    if total <= small_input_elems:
        return _fake_quant_jnp(x, scale), scale

    # Lane-dense 2D slab (rows_needed, 128) at native dtype.
    rows_needed = -(-total // _LANES)
    padded_total = rows_needed * _LANES

    x_flat = x.reshape(-1)
    if padded_total != total:            # lane-tail pad only (< 128 elements)
        x_flat = jnp.pad(x_flat, (0, padded_total - total))
    x2d = x_flat.reshape(rows_needed, _LANES)

    if rows_needed <= _SINGLE_BLOCK_MAX_ROWS:
        # One full-extent block: bypasses (8,128) divisibility and per-step cost.
        tm = rows_needed
    else:
        # Byte-budgeted tile rows (multiple of 8).  Cap at ceil(rows/2) rounded
        # up to 8 so the grid always has >= 2 steps (keeps both v7x TCs busy);
        # the ragged last block is masked by Pallas, no row padding needed.
        budget_rows = max(8, (tile_budget_bytes // (_LANES * itemsize)) // 8 * 8)
        half = -(-rows_needed // 2)
        half_rows = -(-half // 8) * 8
        tm = min(budget_rows, half_rows)
    num_blocks = pl.cdiv(rows_needed, tm)

    sc = jnp.stack([scale, jnp.float32(1.0) / scale]).astype(jnp.float32)

    cost = pl.CostEstimate(
        flops=4 * padded_total,
        transcendentals=0,
        bytes_accessed=2 * padded_total * itemsize,
    )

    out2d = pl.pallas_call(
        _fake_quant_kernel,
        out_shape=jax.ShapeDtypeStruct((rows_needed, _LANES), orig_dtype),
        grid_spec=pltpu.PrefetchScalarGridSpec(
            num_scalar_prefetch=0,
            grid=(num_blocks,),
            in_specs=[
                pl.BlockSpec(memory_space=pltpu.MemorySpace.SMEM),   # [scale, 1/scale]
                pl.BlockSpec((tm, _LANES), lambda i: (i, 0)),        # x tile
            ],
            out_specs=pl.BlockSpec((tm, _LANES), lambda i: (i, 0)),
        ),
        compiler_params=pltpu.CompilerParams(
            dimension_semantics=("parallel",)),    # independent tiles -> both v7x TCs
        cost_estimate=cost,
    )(sc, x2d)

    if padded_total != total:
        out = out2d.reshape(-1)[:total].reshape(orig_shape)
    else:
        out = out2d.reshape(orig_shape)
    return out, scale


def _reference(x, w_scale, act_scale):
    # Matches torch's fake_quantize_per_tensor_affine formulation (inv_scale multiply).
    scale = jnp.float32(w_scale) * jnp.float32(act_scale)
    inv_scale = jnp.float32(1.0) / scale
    q = jnp.clip(jnp.round(x.astype(jnp.float32) * inv_scale), _Q_MIN, _Q_MAX)
    return (q * scale).astype(x.dtype), scale


if __name__ == "__main__":
    key = jax.random.PRNGKey(0)
    w_scale = jnp.float32(0.0123)
    act_scale = jnp.float32(0.0456)

    # 1) Typical small NCHW tensor -> fused jnp fast path.
    x = jax.random.normal(key, (2, 4, 16, 16), dtype=jnp.float32) * 3.0
    out, scale = bias_observer_forward(x, w_scale, act_scale)
    out = jax.block_until_ready(out)
    scale = jax.block_until_ready(scale)
    ref_out, ref_scale = _reference(x, w_scale, act_scale)
    assert out.shape == x.shape and out.dtype == x.dtype
    assert jnp.allclose(out, ref_out, rtol=1e-6, atol=1e-6)
    assert jnp.allclose(scale, ref_scale, rtol=1e-7, atol=0.0)

    # 2) Tiny ragged bias vector (the usual BiasObserver input) -> fast path.
    bias = jax.random.normal(jax.random.PRNGKey(1), (37,), dtype=jnp.float32)
    out_b, _ = bias_observer_forward(bias, w_scale, act_scale)
    out_b = jax.block_until_ready(out_b)
    ref_b, _ = _reference(bias, w_scale, act_scale)
    assert out_b.shape == bias.shape
    assert jnp.allclose(out_b, ref_b, rtol=1e-6, atol=1e-6)

    # 3) Force the Pallas single-block path on the same small tensor.
    out_p, _ = bias_observer_forward(x, w_scale, act_scale, small_input_elems=0)
    out_p = jax.block_until_ready(out_p)
    assert jnp.allclose(out_p, ref_out, rtol=1e-6, atol=1e-6)

    # 4) Ragged multi-block Pallas path: lane-tail pad + ragged last row block.
    #    (small tile budget keeps the test array small while giving grid > 1)
    x_big = jax.random.normal(jax.random.PRNGKey(2), (3, 5, 97, 131),
                              dtype=jnp.float32) * 2.0
    out_big, _ = bias_observer_forward(x_big, w_scale, act_scale,
                                       small_input_elems=0,
                                       tile_budget_bytes=128 * 1024)
    out_big = jax.block_until_ready(out_big)
    ref_big, _ = _reference(x_big, w_scale, act_scale)
    assert out_big.shape == x_big.shape
    assert jnp.allclose(out_big, ref_big, rtol=1e-6, atol=1e-6)

    print("KERNEL_OK")
</pallas_src>

<mosaic_0001>
module attributes {stable_mosaic.version = 11 : i64} {
  func.func @_fake_quant_kernel(%arg0: i32, %arg1: memref<2xf32, #tpu.memory_space<smem>>, %arg2: memref<16x128xf32, #tpu.memory_space<vmem>>, %arg3: memref<16x128xf32, #tpu.memory_space<vmem>>) attributes {dimension_semantics = [#tpu.dimension_semantics<parallel>], iteration_bounds = array<i64: 1>, scalar_prefetch = 0 : i64, scratch_operands = 0 : i64, tpu.core_type = #tpu.core_type<tc>, window_params = [{transform_indices = @transform_0, window_bounds = array<i64: 2>}, {transform_indices = @transform_1, window_bounds = array<i64: 16, 128>}, {transform_indices = @transform_2, window_bounds = array<i64: 16, 128>}]} {
    %c0 = arith.constant 0 : index
    %0 = memref.load %arg1[%c0] : memref<2xf32, #tpu.memory_space<smem>>
    %c1 = arith.constant 1 : index
    %1 = memref.load %arg1[%c1] : memref<2xf32, #tpu.memory_space<smem>>
    %c0_0 = arith.constant 0 : index
    %c0_1 = arith.constant 0 : index
    %2 = vector.load %arg2[%c0_0, %c0_1] : memref<16x128xf32, #tpu.memory_space<vmem>>, vector<16x128xf32>
    %3 = vector.broadcast %1 : f32 to vector<16x128xf32>
    %4 = arith.mulf %2, %3 : vector<16x128xf32>
    %5 = math.roundeven %4 : vector<16x128xf32>
    %cst = arith.constant -2.14748365E+9 : f32
    %cst_2 = arith.constant 2.14748365E+9 : f32
    %6 = vector.broadcast %cst : f32 to vector<16x128xf32>
    %7 = arith.maximumf %6, %5 : vector<16x128xf32>
    %8 = vector.broadcast %cst_2 : f32 to vector<16x128xf32>
    %9 = arith.minimumf %8, %7 : vector<16x128xf32>
    %10 = vector.broadcast %0 : f32 to vector<16x128xf32>
    %11 = arith.mulf %9, %10 : vector<16x128xf32>
    %c0_3 = arith.constant 0 : index
    %c0_4 = arith.constant 0 : index
    %12 = vector.load %arg3[%c0_3, %c0_4] : memref<16x128xf32, #tpu.memory_space<vmem>>, vector<16x128xf32>
    tpu.vector_store %arg3[%c0_3, %c0_4], %11 {strides = array<i32>} : memref<16x128xf32, #tpu.memory_space<vmem>>, vector<16x128xf32>,
    return
  }
  func.func @transform_0(%arg0: i32) -> i32 {
    %c0_i32 = arith.constant 0 : i32
    %c0_i32_0 = arith.constant 0 : i32
    return %c0_i32 : i32
  }
  func.func @transform_1(%arg0: i32) -> (i32, i32) {
    %c0_i32 = arith.constant 0 : i32
    %c0_i32_0 = arith.constant 0 : i32
    return %arg0, %c0_i32 : i32, i32
  }
  func.func @transform_2(%arg0: i32) -> (i32, i32) {
    %c0_i32 = arith.constant 0 : i32
    %c0_i32_0 = arith.constant 0 : i32
    return %arg0, %c0_i32 : i32, i32
  }
}

</mosaic_0001>

<bundles_post_ra>
// kernel: tpu_custom_call.1
= control target key start
LH: loop header
LB: loop body
LE: loop exit
PB: predicated region body
PF: predicated region fallthrough
CT: control target
= control target key end

     0   :  { %7 = vsyncpa [#allocation5], 0  ;;  %s205_s0 = inlined_call_operand.hbm [shape: f32[2], index: 0, kind: input, shape index: {}]   ;;  %s206_s1 = inlined_call_operand.hbm [shape: f32[16,128], index: 1, kind: input, shape index: {}]   ;;  %s207_s2 = inlined_call_operand.hbm [shape: f32[16,128], index: 2, kind: output, shape index: {}]  }
   0x1   :  { %8 = vsyncpa [#allocation3], 0 }
   0x2   :  { %9 = vsyncpa [#allocation4], 0  ;;  %s83_s11 = scalar_lea.hbm %s205_s0, 16 }
   0x3   :  { %p84_p0 = scmp.ne.s32.totalorder %s205_s0, %s83_s11  ;;  %p87_p1 = scmp.lt.u32.totalorder %s83_s11, %s205_s0 }
   0x5   :  { %p89_p2 = pnand %p87_p1, %p84_p0 }
   0x7   :  { %92 = shalt.err (!%p89_p2)
}
   0x8   :  { %s143_s16 = smov [#allocation2]   ;;  %s144_s19 = smov [#allocation6]  }
   0x9   :  { %17 = dma.hbm_to_smem %s205_s0, 16, %s143_s16, [#allocation5]  }
   0xa   :  { %s23_s20 = sshll.u32 %s144_s19, 4  ;;  %s93_s23 = scalar_lea.hbm %s206_s1, 256  ;;  %s24_s20 = int_to_ptr.vmem [resolvable:$true] %s23_s20 }
   0xb   :  { %p94_p3 = scmp.ne.s32.totalorder %s206_s1, %s93_s23  ;;  %p97_p4 = scmp.lt.u32.totalorder %s93_s23, %s206_s1 }
   0xd   :  { %p99_p5 = pnand %p97_p4, %p94_p3 }
   0xf   :  { %102 = shalt.err (!%p99_p5)
}
  0x10   :  { %s103_s28 = scalar_lea.vmem %s24_s20, 256  ;;  %p108_p7 = scmp.lt.s32.totalorder %s24_s20, %s24_s20 }
  0x11   :  { %p104_p6 = scmp.ne.s32.totalorder %s24_s20, %s103_s28  ;;  %p109_p8 = scmp.lt.s32.totalorder %s103_s28, %s103_s28 }
  0x13   :  { %p110_p9 = por %p109_p8, %p108_p7 }
  0x15   :  { %p111_p10 = pnand %p110_p9, %p104_p6 }
  0x17   :  { %114 = shalt.err (!%p111_p10)
}
  0x18   :  { %s145_s0 = smov 128   ;;  %s146_s29 = smov 8  }
  0x19   :  { %29 = dma.hbm_to_vmem [thread:$0]  %s206_s1, 256, %s24_s20, [#allocation3], %s145_s0, %s145_s0, %s146_s29  }
  0x1a   :  { %137 = dma.done.wait [#allocation5], 16  }
  0x1b   :  { %138 = vsyncadd [#allocation5], 4294967280 }
  0x1c   :  { %139 = dma.done.wait [#allocation3], 256  }
  0x1d   :  { %140 = vsyncadd [#allocation3], 4294967040 }
  0x1e   :  { %36 = sfence }
  0x1f   :  { %s73_s4 = sld [smem:[#allocation2 + $0x1]]  ;;  %s37_s5 = sld [smem:[#allocation2]]  ;;  %v39_v0 = vld [vmem:[#allocation6] sm:$0xff]  ;;  %v40_v1 = vld [vmem:[#allocation6 + $0x8] sm:$0xff] }
  0x20   :  { %s147_s6 = smov [#allocation7]  }
  0x21   :  { %s60_s7 = sshll.u32 %s147_s6, 4  ;;  %s61_s7 = int_to_ptr.vmem [resolvable:$true] %s60_s7 }
  0x22   :  { %s115_s1 = scalar_lea.vmem %s61_s7, 256  ;;  %p120_p12 = scmp.lt.s32.totalorder %s61_s7, %s61_s7 }
  0x23   :  { %p116_p11 = scmp.ne.s32.totalorder %s61_s7, %s115_s1  ;;  %p121_p13 = scmp.lt.s32.totalorder %s115_s1, %s115_s1 }
  0x25   :  { %v41_v2 = vstv %s73_s4  ;;  %v50_v7 = vstv %s37_s5  ;;  %p122_p0 = por %p121_p13, %p120_p12 }
  0x26   :  { %v42_v3 = vmul.f32 %v41_v2, %v39_v0  ;;  %v43_v4 = vmul.f32 %v41_v2, %v40_v1 }
  0x27   :  { %p123_p1 = pnand %p122_p0, %p116_p11 }
  0x28   :  { %v76_v5 = vround.rtne.f32 %v42_v3  ;;  %v77_v6 = vround.rtne.f32 %v43_v4 }
  0x2a   :  { %v74_v8 = vclamps-f32 %v76_v5, 2.1474836e+09  ;;  %v75_v9 = vclamps-f32 %v77_v6, 2.1474836e+09 }
  0x2c   :  { %v51_v10 = vmul.f32 %v74_v8, %v50_v7  ;;  %v52_v11 = vmul.f32 %v75_v9, %v50_v7 }
  0x2e   :  { %53 = vst [vmem:[#allocation7] sm:$0xff] %v51_v10  ;;  %54 = vst [vmem:[#allocation7 + $0x8] sm:$0xff] %v52_v11 }
  0x2f   :  { %126 = shalt.err (!%p123_p1)
}
  0x30   :  { %s127_s10 = scalar_lea.hbm %s207_s2, 256 }
  0x31   :  { %p128_p2 = scmp.ne.s32.totalorder %s207_s2, %s127_s10  ;;  %p131_p3 = scmp.lt.u32.totalorder %s127_s10, %s207_s2 }
  0x33   :  { %p133_p4 = pnand %p131_p3, %p128_p2 }
  0x35   :  { %136 = shalt.err (!%p133_p4)
}
  0x36   :  { %66 = dma.vmem_to_hbm [thread:$0]  %s61_s7, 256, %s207_s2, [#allocation4], %s145_s0, %s145_s0, %s146_s29  }
  0x37   :  { %141 = dma.done.wait [#allocation4], 256  }
  0x38   :  { %142 = vsyncadd [#allocation4], 4294967040 }
  0x39   :  { %70 = vsyncpa [#allocation3], 1 }
  0x3a   :  { %71 = vsyncpa [#allocation4], 1 }
  0x3b   :  { %72 = vsyncpa [#allocation5], 1 }

</bundles_post_ra>
